<compile_context>
chip_gen: v7x
topology: tpu7x:2x2x1
jax: 0.10.0
libtpu: 0.0.40
codegen_flags: <defaults>
</compile_context>

<pallas_src>
import math
from functools import partial

import jax
import jax.numpy as jnp
from jax import lax
from jax.experimental import pallas as pl
from jax.experimental.pallas import tpu as pltpu


def _round_up(x, m):
    return (x + m - 1) // m * m


def _vmem_capacity_bytes():
    """Physical VMEM per TensorCore; conservative fallback (v7x = 64 MiB)."""
    try:
        return int(pltpu.get_tpu_info().vmem_capacity_bytes)
    except Exception:
        return 64 * 1024 * 1024


# ----------------------------------------------------------------------------
# Kernel: grid = (batch, seq_tiles).  Per tile: embedding matmul + MLP block,
# accumulate the sequence sum; on the last tile: mean + head linear.
# ----------------------------------------------------------------------------
def _svm_kernel(xs_ref, pos_ref, wc_ref, w1_ref, b1_ref, w2_ref, b2_ref,
                wh_ref, bh_ref, out_ref, acc_ref, *,
                tile_l, seq_len, approx_gelu):
    t = pl.program_id(1)
    nt = pl.num_programs(1)

    @pl.when(t == 0)
    def _init():
        acc_ref[...] = jnp.zeros_like(acc_ref)

    # --- DataEmbedding: pre-stacked circular conv as one matmul + (pos+bc) ---
    emb = jnp.dot(xs_ref[0], wc_ref[...], preferred_element_type=jnp.float32)
    emb = emb + pos_ref[...].astype(jnp.float32)       # conv bias folded into pos

    cdt = w1_ref.dtype                                  # matmul operand dtype

    # --- hidden1 -> GELU -> hidden2 -> GELU + residual (f32 elementwise) ---
    h = jnp.dot(emb.astype(cdt), w1_ref[...],
                preferred_element_type=jnp.float32) + b1_ref[...]
    h = jax.nn.gelu(h, approximate=approx_gelu)
    o = jnp.dot(h.astype(cdt), w2_ref[...],
                preferred_element_type=jnp.float32) + b2_ref[...]
    o = jax.nn.gelu(o, approximate=approx_gelu) + emb

    def accum(vals):
        # Running sum for AdaptiveAvgPool1d(1): reduce (tile_l, D) to (8, D)
        # with a log-depth tree of sublane-aligned adds (VALU only); the final
        # sublane reduce happens once in the finalize step.
        parts = [vals[g * 8:(g + 1) * 8, :] for g in range(tile_l // 8)]
        while len(parts) > 1:
            nxt = [parts[i] + parts[i + 1] for i in range(0, len(parts) - 1, 2)]
            if len(parts) % 2:
                nxt.append(parts[-1])
            parts = nxt
        acc_ref[...] += parts[0]

    tail = seq_len % tile_l
    if tail != 0:
        # Zero-padded rows exist only on the last sequence tile; gate the mask
        # there so the iota/select does not run on every tile.
        @pl.when(t == nt - 1)
        def _acc_masked():
            row = lax.broadcasted_iota(jnp.int32, (tile_l, 1), 0)
            accum(jnp.where(row < tail, o, 0.0))

        @pl.when(t != nt - 1)
        def _acc_full():
            accum(o)
    else:
        accum(o)

    @pl.when(t == nt - 1)
    def _finalize():
        pooled = jnp.sum(acc_ref[...], axis=0, keepdims=True) * (1.0 / seq_len)
        logits = jnp.dot(pooled.astype(wh_ref.dtype), wh_ref[...],
                         preferred_element_type=jnp.float32) + bh_ref[...]
        out_ref[0] = logits                                     # (1, C_pad)


# ----------------------------------------------------------------------------
# Wrapper: pre-stack conv taps, pad matmul output dims to lanes, build grid.
# ----------------------------------------------------------------------------
def svm_forward(x, params, *, tile_l=None, use_bf16=True, approx_gelu=True,
                interpret=False):
    """x: (B, L, F) float32.  Returns logits (B, num_classes) float32."""
    B, L, F = x.shape
    D, H = params["w1"].shape          # d_model, 2*d_model
    C = params["wh"].shape[1]

    LANE, SUB = 128, 16
    K = 3 * F                          # streamed contraction dim, left unpadded
    D_pad = _round_up(D, LANE)
    H_pad = _round_up(H, LANE)
    C_pad = _round_up(C, LANE)

    cdt = jnp.bfloat16 if use_bf16 else jnp.float32
    isz = jnp.dtype(cdt).itemsize

    # Per-generation VMEM budget: 80% of physical per-TC capacity (headroom for
    # compiler scratch); 128 MiB parts (v5e/v6e) get larger default tiles.
    vmem_cap = _vmem_capacity_bytes()
    vmem_budget = int(0.80 * vmem_cap)
    if tile_l is None:
        tile_l = 1024 if vmem_cap >= (96 << 20) else 512

    def working_set(tl):
        streamed = 2 * tl * (K + D_pad) * isz                    # xstack+pos, 2-buf
        weights = 2 * ((K * D_pad + D_pad * H_pad + H_pad * D_pad
                        + D_pad * C_pad) * isz
                       + (H_pad + D_pad + C_pad) * 4)            # default 2-buf
        acts = 2 * 4 * tl * (2 * D_pad + H_pad)                  # emb/h/o + cast slop
        fixed = 8 * D_pad * 4 + 2 * C_pad * 4                    # acc + out
        return streamed + weights + acts + fixed

    tile_l = max(SUB, min(_round_up(tile_l, SUB), _round_up(L, SUB)))
    while working_set(tile_l) > vmem_budget and tile_l > SUB:
        tile_l = max(SUB, _round_up(tile_l // 2, SUB))
    assert working_set(tile_l) <= vmem_budget, (
        f"working set {working_set(tile_l)}B exceeds VMEM budget "
        f"{vmem_budget}B even at tile_l={tile_l}; reduce d_model or tile")

    L_pad = _round_up(L, tile_l)
    n_t = L_pad // tile_l

    # Circular pad (k=3, padding=1, padding_mode='circular') and pre-stack the
    # three conv taps along the feature axis -> one K=3F matmul operand.  The
    # HBM array keeps the true K (no lane padding of the streamed activation).
    # TODO(synk): forming the taps in-kernel (halo tile + shifted slices) would
    # also remove the 3x HBM duplication of x.
    xpad = jnp.concatenate([x[:, -1:, :], x, x[:, :1, :]], axis=1)  # (B, L+2, F)
    xstack = jnp.concatenate([xpad[:, k:k + L, :] for k in range(3)], axis=-1)
    xstack = jnp.pad(xstack, ((0, 0), (0, L_pad - L), (0, 0))).astype(cdt)

    # Fold the conv bias into the positional table; store it in the compute
    # dtype (bf16) since it is the dominant streamed operand (re-read per batch).
    posb = (params["pos"] + params["bc"]).astype(cdt)               # (L, D)
    posb = jnp.pad(posb, ((0, L_pad - L), (0, D_pad - D)))

    def pad_w(w, r, c):
        return jnp.pad(w, ((0, r - w.shape[0]), (0, c - w.shape[1])))

    wc = pad_w(params["wc"].reshape(K, D), K, D_pad).astype(cdt)
    w1 = pad_w(params["w1"], D_pad, H_pad).astype(cdt)
    b1 = pad_w(params["b1"], 1, H_pad)
    w2 = pad_w(params["w2"], H_pad, D_pad).astype(cdt)
    b2 = pad_w(params["b2"], 1, D_pad)
    wh = pad_w(params["wh"], D_pad, C_pad).astype(cdt)
    bh = pad_w(params["bh"], 1, C_pad)

    def full(a):
        # Whole-array VMEM block; constant index -> weights stay resident.
        # (Still default double-buffered; the VMEM budget above covers 2x.)
        return pl.BlockSpec(a.shape, lambda b, t: (0,) * a.ndim)

    in_specs = [
        pl.BlockSpec((1, tile_l, K), lambda b, t: (b, t, 0)),       # xstack
        pl.BlockSpec((tile_l, D_pad), lambda b, t: (t, 0)),         # pos + bc
        full(wc), full(w1), full(b1), full(w2), full(b2), full(wh), full(bh),
    ]
    # Output kept 3D so the block's last-two dims are (1, C_pad): lane-dense,
    # and the per-batch block is revisited across the reduction axis.
    out_spec = pl.BlockSpec((1, 1, C_pad), lambda b, t: (b, 0, 0))

    # TODO(synk): for B == 1 on v7x, split the sequence reduction across the
    # two TensorCores (leading parallel axis of 2 + partial-sum epilogue).
    kernel = partial(_svm_kernel, tile_l=tile_l, seq_len=L,
                     approx_gelu=approx_gelu)

    out = pl.pallas_call(
        kernel,
        out_shape=jax.ShapeDtypeStruct((B, 1, C_pad), jnp.float32),
        grid_spec=pltpu.PrefetchScalarGridSpec(
            num_scalar_prefetch=0,
            grid=(B, n_t),
            in_specs=in_specs,
            out_specs=out_spec,
            scratch_shapes=[pltpu.VMEM((8, D_pad), jnp.float32)],
        ),
        compiler_params=pltpu.CompilerParams(
            dimension_semantics=("parallel", "arbitrary"),
            vmem_limit_bytes=vmem_budget,
        ),
        interpret=interpret,
    )(xstack, posb, wc, w1, b1, w2, b2, wh, bh)

    return out[:, 0, :C]


# ----------------------------------------------------------------------------
# Deterministic parameter construction (kaiming-uniform-ish, bias = 0).
# ----------------------------------------------------------------------------
def kaiming_uniform(key, shape, fan_in):
    gain = math.sqrt(2.0)
    bound = gain * math.sqrt(3.0 / fan_in)
    return jax.random.uniform(key, shape, jnp.float32, -bound, bound)


def sinusoidal_pe(L, D):
    pos = jnp.arange(L, dtype=jnp.float32)[:, None]
    div = jnp.exp(jnp.arange(0, D, 2, dtype=jnp.float32) * -(math.log(10000.0) / D))
    pe = jnp.zeros((L, D), jnp.float32)
    pe = pe.at[:, 0::2].set(jnp.sin(pos * div))
    pe = pe.at[:, 1::2].set(jnp.cos(pos * div))
    return pe


def make_params(key, F, D, C, L):
    ks = jax.random.split(key, 4)
    return {
        "pos": sinusoidal_pe(L, D),                                   # (L, D)
        "wc": kaiming_uniform(ks[0], (3, F, D), fan_in=3 * F),        # conv taps
        "bc": jnp.zeros((1, D), jnp.float32),
        "w1": kaiming_uniform(ks[1], (D, 2 * D), fan_in=D),
        "b1": jnp.zeros((1, 2 * D), jnp.float32),
        "w2": kaiming_uniform(ks[2], (2 * D, D), fan_in=2 * D),
        "b2": jnp.zeros((1, D), jnp.float32),
        "wh": kaiming_uniform(ks[3], (D, C), fan_in=D),               # MLP head
        "bh": jnp.zeros((1, C), jnp.float32),
    }


# Pure-JAX reference. use_bf16/approx_gelu=False gives f32 / exact-erf (PyTorch
# nn.GELU) math; True mirrors the kernel's bf16-MXU / bf16-pos / tanh-GELU math.
def svm_reference(x, p, *, use_bf16=False, approx_gelu=False):
    B, L, F = x.shape
    xpad = jnp.concatenate([x[:, -1:, :], x, x[:, :1, :]], axis=1)
    xstack = jnp.concatenate([xpad[:, k:k + L, :] for k in range(3)], axis=-1)
    wc = p["wc"].reshape(3 * F, -1)

    cdt = jnp.bfloat16 if use_bf16 else jnp.float32
    dot = lambda a, b: jnp.dot(a.astype(cdt), b.astype(cdt),
                               preferred_element_type=jnp.float32)
    act = lambda v: jax.nn.gelu(v, approximate=approx_gelu)

    posb = (p["pos"] + p["bc"]).astype(cdt).astype(jnp.float32)      # (L, D)
    emb = dot(xstack, wc) + posb[None]
    h = act(dot(emb, p["w1"]) + p["b1"][None])
    o = act(dot(h, p["w2"]) + p["b2"][None]) + emb
    pooled = jnp.mean(o, axis=1)
    return dot(pooled, p["wh"]) + p["bh"]


if __name__ == "__main__":
    B, L, F, D, C = 2, 8, 4, 32, 6   # batch, seq, feature_num, d_model, classes

    key = jax.random.PRNGKey(0)
    kx, kp = jax.random.split(key)
    x = jax.random.normal(kx, (B, L, F), jnp.float32)
    params = make_params(kp, F, D, C, L)

    logits = jax.block_until_ready(svm_forward(x, params))
    assert logits.shape == (B, C)

    # Tight correctness check vs a reference mirroring the kernel's math
    # (bf16 MXU operands, bf16 pos table, f32 accumulation, tanh GELU).
    ref_mirror = svm_reference(x, params, use_bf16=True, approx_gelu=True)
    assert jnp.allclose(logits, ref_mirror, atol=2e-3, rtol=2e-3), \
        "mismatch vs bf16-mirrored reference"

    # Fidelity check vs f32 / exact-erf GELU (PyTorch nn.GELU) semantics;
    # tolerance = bf16 + tanh-GELU drift budget.
    ref_f32 = svm_reference(x, params)
    assert jnp.allclose(logits, ref_f32, atol=1e-1, rtol=1e-1), \
        "drift vs f32 reference exceeds bf16/tanh-GELU budget"

    print("KERNEL_OK")
</pallas_src>

<mosaic_0001>
module attributes {stable_mosaic.version = 11 : i64} {
  func.func @_svm_kernel(%arg0: i32, %arg1: i32, %arg2: memref<1x16x12xbf16, #tpu.memory_space<vmem>>, %arg3: memref<16x128xbf16, #tpu.memory_space<vmem>>, %arg4: memref<12x128xbf16, #tpu.memory_space<vmem>>, %arg5: memref<128x128xbf16, #tpu.memory_space<vmem>>, %arg6: memref<1x128xf32, #tpu.memory_space<vmem>>, %arg7: memref<128x128xbf16, #tpu.memory_space<vmem>>, %arg8: memref<1x128xf32, #tpu.memory_space<vmem>>, %arg9: memref<128x128xbf16, #tpu.memory_space<vmem>>, %arg10: memref<1x128xf32, #tpu.memory_space<vmem>>, %arg11: memref<1x1x128xf32, #tpu.memory_space<vmem>>, %arg12: memref<8x128xf32, #tpu.memory_space<vmem>>) attributes {dimension_semantics = [#tpu.dimension_semantics<parallel>, #tpu.dimension_semantics<arbitrary>], iteration_bounds = array<i64: 2, 1>, scalar_prefetch = 0 : i64, scratch_operands = 1 : i64, tpu.core_type = #tpu.core_type<tc>, window_params = [{transform_indices = @transform_0, window_bounds = array<i64: 1, 16, 12>}, {transform_indices = @transform_1, window_bounds = array<i64: 16, 128>}, {pipeline_mode = #tpu.pipeline_mode<synchronous>, transform_indices = @transform_2, window_bounds = array<i64: 12, 128>}, {pipeline_mode = #tpu.pipeline_mode<synchronous>, transform_indices = @transform_3, window_bounds = array<i64: 128, 128>}, {pipeline_mode = #tpu.pipeline_mode<synchronous>, transform_indices = @transform_4, window_bounds = array<i64: 1, 128>}, {pipeline_mode = #tpu.pipeline_mode<synchronous>, transform_indices = @transform_5, window_bounds = array<i64: 128, 128>}, {pipeline_mode = #tpu.pipeline_mode<synchronous>, transform_indices = @transform_6, window_bounds = array<i64: 1, 128>}, {pipeline_mode = #tpu.pipeline_mode<synchronous>, transform_indices = @transform_7, window_bounds = array<i64: 128, 128>}, {pipeline_mode = #tpu.pipeline_mode<synchronous>, transform_indices = @transform_8, window_bounds = array<i64: 1, 128>}, {transform_indices = @transform_9, window_bounds = array<i64: 1, 1, 128>}]} {
    %c0_i32 = arith.constant 0 : i32
    %0 = arith.cmpi eq, %arg1, %c0_i32 : i32
    %1 = arith.extui %0 : i1 to i32
    %c0_i32_0 = arith.constant 0 : i32
    %2 = arith.cmpi ne, %1, %c0_i32_0 : i32
    scf.if %2 {
      %cst_31 = arith.constant 0.000000e+00 : f32
      %58 = vector.broadcast %cst_31 : f32 to vector<8x128xf32>
      %c0_32 = arith.constant 0 : index
      %c0_33 = arith.constant 0 : index
      %59 = vector.load %arg12[%c0_32, %c0_33] : memref<8x128xf32, #tpu.memory_space<vmem>>, vector<8x128xf32>
      tpu.vector_store %arg12[%c0_32, %c0_33], %58 {strides = array<i32>} : memref<8x128xf32, #tpu.memory_space<vmem>>, vector<8x128xf32>,
    } else {
    }
    %c0 = arith.constant 0 : index
    %c0_1 = arith.constant 0 : index
    %c0_2 = arith.constant 0 : index
    %3 = vector.load %arg2[%c0, %c0_1, %c0_2] : memref<1x16x12xbf16, #tpu.memory_space<vmem>>, vector<1x16x12xbf16>
    %4 = vector.shape_cast %3 : vector<1x16x12xbf16> to vector<16x12xbf16>
    %c0_3 = arith.constant 0 : index
    %c0_4 = arith.constant 0 : index
    %5 = vector.load %arg4[%c0_3, %c0_4] : memref<12x128xbf16, #tpu.memory_space<vmem>>, vector<12x128xbf16>
    %cst = arith.constant dense<0.000000e+00> : vector<16x128xf32>
    %6 = tpu.matmul %4, %5, %cst {dimension_numbers = #tpu.dot_dimension_numbers<[1], [0], [0], [1], [0, 0, 1, 1], [], []>} : vector<16x12xbf16>, vector<12x128xbf16>, vector<16x128xf32> -> vector<16x128xf32>
    %c0_5 = arith.constant 0 : index
    %c0_6 = arith.constant 0 : index
    %7 = vector.load %arg3[%c0_5, %c0_6] : memref<16x128xbf16, #tpu.memory_space<vmem>>, vector<16x128xbf16>
    %8 = arith.extf %7 : vector<16x128xbf16> to vector<16x128xf32>
    %9 = arith.addf %6, %8 : vector<16x128xf32>
    %10 = arith.truncf %9 : vector<16x128xf32> to vector<16x128xbf16>
    %c0_7 = arith.constant 0 : index
    %c0_8 = arith.constant 0 : index
    %11 = vector.load %arg5[%c0_7, %c0_8] : memref<128x128xbf16, #tpu.memory_space<vmem>>, vector<128x128xbf16>
    %cst_9 = arith.constant dense<0.000000e+00> : vector<16x128xf32>
    %12 = tpu.matmul %10, %11, %cst_9 {dimension_numbers = #tpu.dot_dimension_numbers<[1], [0], [0], [1], [0, 0, 1, 1], [], []>} : vector<16x128xbf16>, vector<128x128xbf16>, vector<16x128xf32> -> vector<16x128xf32>
    %c0_10 = arith.constant 0 : index
    %c0_11 = arith.constant 0 : index
    %13 = vector.load %arg6[%c0_10, %c0_11] : memref<1x128xf32, #tpu.memory_space<vmem>>, vector<1x128xf32>
    %14 = vector.broadcast %13 : vector<1x128xf32> to vector<16x128xf32>
    %15 = arith.addf %12, %14 : vector<16x128xf32>
    %16 = arith.mulf %15, %15 : vector<16x128xf32>
    %17 = arith.mulf %15, %16 : vector<16x128xf32>
    %cst_12 = arith.constant 4.471500e-02 : f32
    %18 = vector.broadcast %cst_12 : f32 to vector<16x128xf32>
    %19 = arith.mulf %18, %17 : vector<16x128xf32>
    %20 = arith.addf %15, %19 : vector<16x128xf32>
    %cst_13 = arith.constant 0.797884583 : f32
    %21 = vector.broadcast %cst_13 : f32 to vector<16x128xf32>
    %22 = arith.mulf %21, %20 : vector<16x128xf32>
    %23 = math.tanh %22 : vector<16x128xf32>
    %cst_14 = arith.constant 1.000000e+00 : f32
    %24 = vector.broadcast %cst_14 : f32 to vector<16x128xf32>
    %25 = arith.addf %24, %23 : vector<16x128xf32>
    %cst_15 = arith.constant 5.000000e-01 : f32
    %26 = vector.broadcast %cst_15 : f32 to vector<16x128xf32>
    %27 = arith.mulf %26, %25 : vector<16x128xf32>
    %28 = arith.mulf %15, %27 : vector<16x128xf32>
    %29 = arith.truncf %28 : vector<16x128xf32> to vector<16x128xbf16>
    %c0_16 = arith.constant 0 : index
    %c0_17 = arith.constant 0 : index
    %30 = vector.load %arg7[%c0_16, %c0_17] : memref<128x128xbf16, #tpu.memory_space<vmem>>, vector<128x128xbf16>
    %cst_18 = arith.constant dense<0.000000e+00> : vector<16x128xf32>
    %31 = tpu.matmul %29, %30, %cst_18 {dimension_numbers = #tpu.dot_dimension_numbers<[1], [0], [0], [1], [0, 0, 1, 1], [], []>} : vector<16x128xbf16>, vector<128x128xbf16>, vector<16x128xf32> -> vector<16x128xf32>
    %c0_19 = arith.constant 0 : index
    %c0_20 = arith.constant 0 : index
    %32 = vector.load %arg8[%c0_19, %c0_20] : memref<1x128xf32, #tpu.memory_space<vmem>>, vector<1x128xf32>
    %33 = vector.broadcast %32 : vector<1x128xf32> to vector<16x128xf32>
    %34 = arith.addf %31, %33 : vector<16x128xf32>
    %35 = arith.mulf %34, %34 : vector<16x128xf32>
    %36 = arith.mulf %34, %35 : vector<16x128xf32>
    %cst_21 = arith.constant 4.471500e-02 : f32
    %37 = vector.broadcast %cst_21 : f32 to vector<16x128xf32>
    %38 = arith.mulf %37, %36 : vector<16x128xf32>
    %39 = arith.addf %34, %38 : vector<16x128xf32>
    %cst_22 = arith.constant 0.797884583 : f32
    %40 = vector.broadcast %cst_22 : f32 to vector<16x128xf32>
    %41 = arith.mulf %40, %39 : vector<16x128xf32>
    %42 = math.tanh %41 : vector<16x128xf32>
    %cst_23 = arith.constant 1.000000e+00 : f32
    %43 = vector.broadcast %cst_23 : f32 to vector<16x128xf32>
    %44 = arith.addf %43, %42 : vector<16x128xf32>
    %cst_24 = arith.constant 5.000000e-01 : f32
    %45 = vector.broadcast %cst_24 : f32 to vector<16x128xf32>
    %46 = arith.mulf %45, %44 : vector<16x128xf32>
    %47 = arith.mulf %34, %46 : vector<16x128xf32>
    %48 = arith.addf %47, %9 : vector<16x128xf32>
    %c0_i32_25 = arith.constant 0 : i32
    %49 = arith.cmpi eq, %arg1, %c0_i32_25 : i32
    %50 = arith.extui %49 : i1 to i32
    %c0_i32_26 = arith.constant 0 : i32
    %51 = arith.cmpi ne, %50, %c0_i32_26 : i32
    scf.if %51 {
      %58 = tpu.iota {dimensions = array<i32: 0>} : vector<16x1xi32>
      %c8_i32 = arith.constant 8 : i32
      %59 = vector.broadcast %c8_i32 : i32 to vector<16x1xi32>
      %60 = arith.cmpi slt, %58, %59 : vector<16x1xi32>
      %cst_31 = arith.constant 0.000000e+00 : f32
      %61 = vector.shape_cast %60 : vector<16x1xi1> to vector<16x1xi1>
      %62 = vector.broadcast %61 : vector<16x1xi1> to vector<16x128xi1>
      %63 = vector.broadcast %cst_31 : f32 to vector<16x128xf32>
      %64 = arith.select %62, %48, %63 : vector<16x128xi1>, vector<16x128xf32>
      %65 = vector.extract_strided_slice %64 {offsets = [0, 0], sizes = [8, 128], strides = [1, 1]} : vector<16x128xf32> to vector<8x128xf32>
      %66 = vector.extract_strided_slice %64 {offsets = [8, 0], sizes = [8, 128], strides = [1, 1]} : vector<16x128xf32> to vector<8x128xf32>
      %67 = arith.addf %65, %66 : vector<8x128xf32>
      %c0_32 = arith.constant 0 : index
      %c0_33 = arith.constant 0 : index
      %68 = vector.load %arg12[%c0_32, %c0_33] : memref<8x128xf32, #tpu.memory_space<vmem>>, vector<8x128xf32>
      %69 = arith.addf %68, %67 : vector<8x128xf32>
      %c0_34 = arith.constant 0 : index
      %c0_35 = arith.constant 0 : index
      %70 = vector.load %arg12[%c0_34, %c0_35] : memref<8x128xf32, #tpu.memory_space<vmem>>, vector<8x128xf32>
      tpu.vector_store %arg12[%c0_34, %c0_35], %69 {strides = array<i32>} : memref<8x128xf32, #tpu.memory_space<vmem>>, vector<8x128xf32>,
    } else {
    }
    %c0_i32_27 = arith.constant 0 : i32
    %52 = arith.cmpi ne, %arg1, %c0_i32_27 : i32
    %53 = arith.extui %52 : i1 to i32
    %c0_i32_28 = arith.constant 0 : i32
    %54 = arith.cmpi ne, %53, %c0_i32_28 : i32
    scf.if %54 {
      %58 = vector.extract_strided_slice %48 {offsets = [0, 0], sizes = [8, 128], strides = [1, 1]} : vector<16x128xf32> to vector<8x128xf32>
      %59 = vector.extract_strided_slice %48 {offsets = [8, 0], sizes = [8, 128], strides = [1, 1]} : vector<16x128xf32> to vector<8x128xf32>
      %60 = arith.addf %58, %59 : vector<8x128xf32>
      %c0_31 = arith.constant 0 : index
      %c0_32 = arith.constant 0 : index
      %61 = vector.load %arg12[%c0_31, %c0_32] : memref<8x128xf32, #tpu.memory_space<vmem>>, vector<8x128xf32>
      %62 = arith.addf %61, %60 : vector<8x128xf32>
      %c0_33 = arith.constant 0 : index
      %c0_34 = arith.constant 0 : index
      %63 = vector.load %arg12[%c0_33, %c0_34] : memref<8x128xf32, #tpu.memory_space<vmem>>, vector<8x128xf32>
      tpu.vector_store %arg12[%c0_33, %c0_34], %62 {strides = array<i32>} : memref<8x128xf32, #tpu.memory_space<vmem>>, vector<8x128xf32>,
    } else {
    }
    %c0_i32_29 = arith.constant 0 : i32
    %55 = arith.cmpi eq, %arg1, %c0_i32_29 : i32
    %56 = arith.extui %55 : i1 to i32
    %c0_i32_30 = arith.constant 0 : i32
    %57 = arith.cmpi ne, %56, %c0_i32_30 : i32
    scf.if %57 {
      %c0_31 = arith.constant 0 : index
      %c0_32 = arith.constant 0 : index
      %58 = vector.load %arg12[%c0_31, %c0_32] : memref<8x128xf32, #tpu.memory_space<vmem>>, vector<8x128xf32>
      %cst_33 = arith.constant dense<0.000000e+00> : vector<128xf32>
      %59 = vector.multi_reduction <add>, %58, %cst_33 [0] : vector<8x128xf32> to vector<128xf32>
      %60 = vector.shape_cast %59 : vector<128xf32> to vector<1x128xf32>
      %cst_34 = arith.constant 1.250000e-01 : f32
      %61 = vector.broadcast %cst_34 : f32 to vector<1x128xf32>
      %62 = arith.mulf %60, %61 : vector<1x128xf32>
      %63 = arith.truncf %62 : vector<1x128xf32> to vector<1x128xbf16>
      %c0_35 = arith.constant 0 : index
      %c0_36 = arith.constant 0 : index
      %64 = vector.load %arg9[%c0_35, %c0_36] : memref<128x128xbf16, #tpu.memory_space<vmem>>, vector<128x128xbf16>
      %cst_37 = arith.constant dense<0.000000e+00> : vector<1x128xf32>
      %65 = tpu.matmul %63, %64, %cst_37 {dimension_numbers = #tpu.dot_dimension_numbers<[1], [0], [0], [1], [0, 0, 1, 1], [], []>} : vector<1x128xbf16>, vector<128x128xbf16>, vector<1x128xf32> -> vector<1x128xf32>
      %c0_38 = arith.constant 0 : index
      %c0_39 = arith.constant 0 : index
      %66 = vector.load %arg10[%c0_38, %c0_39] : memref<1x128xf32, #tpu.memory_space<vmem>>, vector<1x128xf32>
      %67 = arith.addf %65, %66 : vector<1x128xf32>
      %c0_40 = arith.constant 0 : index
      %c0_41 = arith.constant 0 : index
      %c0_42 = arith.constant 0 : index
      %68 = vector.load %arg11[%c0_40, %c0_41, %c0_42] : memref<1x1x128xf32, #tpu.memory_space<vmem>>, vector<1x1x128xf32>
      %69 = vector.shape_cast %68 : vector<1x1x128xf32> to vector<1x128xf32>
      %70 = vector.shape_cast %67 : vector<1x128xf32> to vector<1x1x128xf32>
      tpu.vector_store %arg11[%c0_40, %c0_41, %c0_42], %70 {strides = array<i32>} : memref<1x1x128xf32, #tpu.memory_space<vmem>>, vector<1x1x128xf32>,
    } else {
    }
    return
  }
  func.func @transform_0(%arg0: i32, %arg1: i32) -> (i32, i32, i32) {
    %c0_i32 = arith.constant 0 : i32
    %c0_i32_0 = arith.constant 0 : i32
    return %arg0, %arg1, %c0_i32 : i32, i32, i32
  }
  func.func @transform_1(%arg0: i32, %arg1: i32) -> (i32, i32) {
    %c0_i32 = arith.constant 0 : i32
    %c0_i32_0 = arith.constant 0 : i32
    return %arg1, %c0_i32 : i32, i32
  }
  func.func @transform_2(%arg0: i32, %arg1: i32) -> (i32, i32) {
    %c0_i32 = arith.constant 0 : i32
    %c0_i32_0 = arith.constant 0 : i32
    %c0_i32_1 = arith.constant 0 : i32
    return %c0_i32, %c0_i32_0 : i32, i32
  }
  func.func @transform_3(%arg0: i32, %arg1: i32) -> (i32, i32) {
    %c0_i32 = arith.constant 0 : i32
    %c0_i32_0 = arith.constant 0 : i32
    %c0_i32_1 = arith.constant 0 : i32
    return %c0_i32, %c0_i32_0 : i32, i32
  }
  func.func @transform_4(%arg0: i32, %arg1: i32) -> (i32, i32) {
    %c0_i32 = arith.constant 0 : i32
    %c0_i32_0 = arith.constant 0 : i32
    %c0_i32_1 = arith.constant 0 : i32
    return %c0_i32, %c0_i32_0 : i32, i32
  }
  func.func @transform_5(%arg0: i32, %arg1: i32) -> (i32, i32) {
    %c0_i32 = arith.constant 0 : i32
    %c0_i32_0 = arith.constant 0 : i32
    %c0_i32_1 = arith.constant 0 : i32
    return %c0_i32, %c0_i32_0 : i32, i32
  }
  func.func @transform_6(%arg0: i32, %arg1: i32) -> (i32, i32) {
    %c0_i32 = arith.constant 0 : i32
    %c0_i32_0 = arith.constant 0 : i32
    %c0_i32_1 = arith.constant 0 : i32
    return %c0_i32, %c0_i32_0 : i32, i32
  }
  func.func @transform_7(%arg0: i32, %arg1: i32) -> (i32, i32) {
    %c0_i32 = arith.constant 0 : i32
    %c0_i32_0 = arith.constant 0 : i32
    %c0_i32_1 = arith.constant 0 : i32
    return %c0_i32, %c0_i32_0 : i32, i32
  }
  func.func @transform_8(%arg0: i32, %arg1: i32) -> (i32, i32) {
    %c0_i32 = arith.constant 0 : i32
    %c0_i32_0 = arith.constant 0 : i32
    %c0_i32_1 = arith.constant 0 : i32
    return %c0_i32, %c0_i32_0 : i32, i32
  }
  func.func @transform_9(%arg0: i32, %arg1: i32) -> (i32, i32, i32) {
    %c0_i32 = arith.constant 0 : i32
    %c0_i32_0 = arith.constant 0 : i32
    %c0_i32_1 = arith.constant 0 : i32
    return %arg0, %c0_i32, %c0_i32_0 : i32, i32, i32
  }
}

</mosaic_0001>

<bundles_post_ra>
// kernel: tpu_custom_call.1
= control target key start
LH: loop header
LB: loop body
LE: loop exit
PB: predicated region body
PF: predicated region fallthrough
CT: control target
= control target key end

     0   :  { %s1790_s0 = inlined_call_operand.vmem [shape: bf16[2,16,12], index: 0, kind: input, shape index: {}]   ;;  %s1791_s1 = inlined_call_operand.vmem [shape: bf16[16,128], index: 1, kind: input, shape index: {}]   ;;  %s1792_s2 = inlined_call_operand.vmem [shape: bf16[12,128], index: 2, kind: input, shape index: {}]   ;;  %s1793_s3 = inlined_call_operand.hbm [shape: bf16[128,128], index: 3, kind: input, shape index: {}]   ;;  %s1794_s4 = inlined_call_operand.vmem [shape: f32[1,128], index: 4, kind: input, shape index: {}]   ;;  %s1795_s5 = inlined_call_operand.hbm [shape: bf16[128,128], index: 5, kind: input, shape index: {}]   ;;  %s1796_s6 = inlined_call_operand.vmem [shape: f32[1,128], index: 6, kind: input, shape index: {}]   ;;  %s1797_s7 = inlined_call_operand.hbm [shape: bf16[128,128], index: 7, kind: input, shape index: {}]   ;;  %s1798_s8 = inlined_call_operand.vmem [shape: f32[1,128], index: 8, kind: input, shape index: {}]   ;;  %s1799_s9 = inlined_call_operand.hbm [shape: f32[2,1,128], index: 9, kind: output, shape index: {}]  }
   0x1   :  { %1809 = sst [smem:[#allocation19_spill]] %s1795_s5 }
   0x2   :  { %14 = vsyncpa [#allocation4], 0 }
   0x3   :  { %15 = vsyncpa [#allocation7], 0 }
   0x4   :  { %16 = vsyncpa [#allocation5], 0 }
   0x5   :  { %18 = vsyncpa [#allocation5 + $0x1], 0  ;;  %s1531_s30 = smov 0   ;;  %s1533_s10 = smov 0  }
   0x6   :  { %s1535_s11 = smov 0   ;;  %s1537_s12 = smov 0  }
   0x7   :  { %s1539_s13 = smov 0   ;;  %s1541_s14 = smov 0  }
   0x8 LB: > { %1810 = sst [smem:[#allocation13_spill]] %s1451_s30  ;;  %s1033_s15 = sadd.s32 4294967295, %s1471_s14   ;;  %s1471_s14 = sphi %s1541_s14, %s24_s14   ;;  %s1467_s13 = sphi %s1539_s13, %s1832_s13   ;;  %s1463_s12 = sphi %s1537_s12, %s1831_s12   ;;  %s1459_s11 = sphi %s1535_s11, %s1830_s11   ;;  %s1455_s10 = sphi %s1533_s10, %s1834_s10   ;;  %s1451_s30 = sphi %s1531_s30, %s1833_s30  }
   0x9   : > { %1811 = sst [smem:[#allocation14_spill]] %s1459_s11  ;;  %s1034_s16 = sadd.s32 4294967294, %s1471_s14  }
   0xa   : > { %1812 = sst [smem:[#allocation15_spill]] %s1467_s13  ;;  %s36_s17 = sadd.s32 1, %s1467_s13 }
   0xb   : > { %s244_s18 = sadd.s32 1, %s1459_s11  ;;  %p38_p0 = scmp.ge.s32.totalorder %s36_s17, 2 }
   0xc   : > { %p254_p1 = scmp.ne.s32.totalorder %s1459_s11, %s1455_s10  ;;  %p255_p2 = scmp.eq.s32.totalorder %s1033_s15, 1 }
   0xd   : > { %p260_p3 = scmp.ne.s32.totalorder %s1455_s10, %s1451_s30  ;;  %s1836_s17 = smov (%p38_p0, %s36_s17), 0 }
   0xe   : > { %1813 = sst [smem:[#allocation16_spill]] %s1836_s17  ;;  %p1571_p4 = por %p255_p2, %p254_p1 }
   0xf   : > { %p261_p5 = scmp.eq.s32.totalorder %s1034_s16, 1  ;;  %s241_s20 = ssub.s32 %s1467_s13, %s1836_s17 }
  0x10   : > { %s1814_s19 = scalar_select %p1571_p4, 1, 0 }
  0x11   : > { %p1035_p6 = scmp.ge.s32.totalorder %s1471_s14, 1  ;;  %p242_p7 = scmp.eq.s32.totalorder %s241_s20, 0 }
  0x12   : > { %p1578_p8 = por %p261_p5, %p260_p3  ;;  %p268_p9 = scmp.lt.s32.totalorder %s1471_s14, 3 }
  0x13   : > { %s1584_s22 = scalar_select %p242_p7, %s1459_s11, %s244_s18  }
  0x14   : > { %s1815_s21 = scalar_select %p1578_p8, 1, 0 }
  0x15   : > { %1817 = sst [smem:[#allocation18_spill]] %s1584_s22  ;;  %p1586_p10 = pnand %p1035_p6, %p268_p9 }
  0x16   : > { %1816 = sst [smem:[#allocation17_spill]] %s1815_s21  ;;  %p1590_p11 = scmp.eq.s32.totalorder %s1033_s15, 0 }
  0x17   : > { %s1818_s23 = scalar_select %p1586_p10, 1, 0 }
  0x18   : > { %s1819_s24 = scalar_select %p1590_p11, 1, 0 }
  0x19   : > { %p1193_p12 = pneg %p1586_p10  ;;  %s1473_s25 = smov [#allocation6]  }
  0x1a   : > { %s308_s26 = sshll.u32 %s1473_s25, 4  ;;  %s1474_s28 = smov [#allocation3]   ;;  %s309_s26 = int_to_ptr.vmem [resolvable:$true] %s308_s26 }
  0x1b   : > { %p1598_p13 = pnand %p1590_p11, %p1193_p12  ;;  %s292_s29 = sshll.u32 %s1474_s28, 4  ;;  %s293_s29 = int_to_ptr.vmem [resolvable:$true] %s292_s29 }
  0x1c   : > { %s1821_s5 = sld [smem:[#allocation19_spill]] }
  0x1d   : > { %p1610_p1 = pneg %p1598_p13 }
  0x22   : > { %s1301_s15 = scalar_lea.hbm %s1821_s5, 1024 }
  0x23   : > { %p1302_p0 = scmp.ne.s32.totalorder %s1821_s5, %s1301_s15  ;;  %p1308_p5 = scmp.lt.u32.totalorder %s1301_s15, %s1821_s5 }
  0x25   : > { %p1304_p2 = pnand %p1610_p1, %p1302_p0 }
  0x27   : > { %p1305_p3 = pneg %p1304_p2 }
  0x29   : > { %p1310_p6 = pnand %p1308_p5, %p1305_p3 }
  0x2b   : > { %1313 = shalt.err (!%p1310_p6)
}
  0x2c   : > { %s1314_s28 = scalar_lea.vmem %s309_s26, 1024  ;;  %p1322_p8 = scmp.lt.s32.totalorder %s309_s26, %s309_s26 }
  0x2d   : > { %p1315_p7 = scmp.ne.s32.totalorder %s309_s26, %s1314_s28  ;;  %p1323_p4 = scmp.lt.s32.totalorder %s1314_s28, %s1314_s28 }
  0x2f   : > { %p1317_p9 = pnand %p1315_p7, %p1610_p1  ;;  %p1324_p11 = por %p1323_p4, %p1322_p8 }
  0x31   : > { %p1318_p12 = pneg %p1317_p9 }
  0x33   : > { %p1325_p10 = pnand %p1324_p11, %p1318_p12 }
  0x35   : > { %1328 = shalt.err (!%p1325_p10)
}
  0x36   : > { %s1475_s17 = smov 64   ;;  %s1476_s16 = smov 4  }
  0x37   : > { %1199 = dma.hbm_to_vmem [thread:$0]  (!%p1598_p13), %s1821_s5, 1024, %s309_s26, [#allocation7], %s1475_s17, %s1475_s17, %s1476_s16  }
  0x38   : > { %s1329_s20 = scalar_lea.hbm %s1793_s3, 1024 }
  0x39   : > { %p1330_p4 = scmp.ne.s32.totalorder %s1793_s3, %s1329_s20  ;;  %p1336_p11 = scmp.lt.u32.totalorder %s1329_s20, %s1793_s3 }
  0x3b   : > { %p1332_p8 = pnand %p1330_p4, %p1610_p1 }
  0x3d   : > { %p1333_p10 = pneg %p1332_p8 }
  0x3f   : > { %p1338_p0 = pnand %p1336_p11, %p1333_p10 }
  0x41   : > { %1341 = shalt.err (!%p1338_p0)
}
  0x42   : > { %s1342_s13 = scalar_lea.vmem %s293_s29, 1024  ;;  %p1350_p6 = scmp.lt.s32.totalorder %s293_s29, %s293_s29 }
  0x43   : > { %p1343_p2 = scmp.ne.s32.totalorder %s293_s29, %s1342_s13  ;;  %p1351_p7 = scmp.lt.s32.totalorder %s1342_s13, %s1342_s13 }
  0x45   : > { %p1345_p3 = pnand %p1343_p2, %p1610_p1  ;;  %p1352_p9 = por %p1351_p7, %p1350_p6 }
  0x47   : > { %p1346_p5 = pneg %p1345_p3 }
  0x49   : > { %p1353_p12 = pnand %p1352_p9, %p1346_p5 }
  0x4b   : > { %1356 = shalt.err (!%p1353_p12)
}
  0x4c   : > { %1196 = dma.hbm_to_vmem [thread:$0]  (!%p1598_p13), %s1793_s3, 1024, %s293_s29, [#allocation4], %s1475_s17, %s1475_s17, %s1476_s16  }
  0x4d   : > { %s1477_s21 = smov [#allocation8]   ;;  %s1357_s15 = scalar_lea.hbm %s1797_s7, 1024 }
  0x4e   : > { %s324_s26 = sshll.u32 %s1477_s21, 4  ;;  %p1358_p4 = scmp.ne.s32.totalorder %s1797_s7, %s1357_s15  ;;  %s325_s26 = int_to_ptr.vmem [resolvable:$true] %s324_s26 }
  0x4f   : > { %p1364_p11 = scmp.lt.u32.totalorder %s1357_s15, %s1797_s7 }
  0x50   : > { %p1360_p8 = pnand %p1358_p4, %p1610_p1 }
  0x52   : > { %p1361_p10 = pneg %p1360_p8 }
  0x54   : > { %p1366_p0 = pnand %p1364_p11, %p1361_p10 }
  0x56   : > { %1369 = shalt.err (!%p1366_p0)
}
  0x57   : > { %s1370_s29 = scalar_lea.vmem %s325_s26, 1024  ;;  %p1378_p6 = scmp.lt.s32.totalorder %s325_s26, %s325_s26 }
  0x58   : > { %p1371_p2 = scmp.ne.s32.totalorder %s325_s26, %s1370_s29  ;;  %p1379_p7 = scmp.lt.s32.totalorder %s1370_s29, %s1370_s29 }
  0x5a   : > { %p1373_p3 = pnand %p1371_p2, %p1610_p1  ;;  %p1380_p9 = por %p1379_p7, %p1378_p6 }
  0x5c   : > { %p1374_p5 = pneg %p1373_p3 }
  0x5e   : > { %p1381_p12 = pnand %p1380_p9, %p1374_p5 }
  0x60   : > { %1384 = shalt.err (!%p1381_p12)
}
  0x61   : > { %1202 = dma.hbm_to_vmem [thread:$0]  (!%p1598_p13), %s1797_s7, 1024, %s325_s26, [#allocation7], %s1475_s17, %s1475_s17, %s1476_s16  }
  0x62   : > { %p1823_p4 = scmp.ne.s32.totalorder %s1818_s23, 0 }
  0x63   : > { %p1824_p1 = scmp.ne.s32.totalorder (!%p1823_p4), %s1819_s24, 0 }
  0x64   : > { %356 = sbr.rel (%p1823_p4) target bundleno = 1067 (0x42b), region = 56 }
  0x6b   : > { %1438 = dma.done.wait (%p1824_p1), [#allocation4], 1024  }
  0x6c   : > { %1440 = vsyncadd (%p1824_p1), [#allocation4], 4294966272 }
  0x6d   : > { %1442 = dma.done.wait (%p1824_p1), [#allocation7], 2048  }
  0x6e   : > { %1444 = vsyncadd (%p1824_p1), [#allocation7], 4294965248  ;;  %p409_p8 = scmp.lt.s32.totalorder %s1463_s12, 1  ;;  %v1478_v0 = vmov 0.0   ;;  %vm1479_vm0 = vmmov 0   ;;  %vm452_vm1 = vcmask 1045504  }
  0x6f   : > { %1113 = vmatprep.subr.bf16.mxu0 %v1478_v0  ;;  %1115 = vmatprep.mubr.msk.bf16.mxu0 %vm1479_vm0, %v1478_v0  ;;  %v1269_v1 = vld [vmem:[%s1792_s2] sm:$0x3f]   ;;  %v1271_v4 = vld [vmem:[#allocation3] sm:$0xff]   ;;  %vm448_vm2 = vcmask 97280   ;;  %v1272_v5 = vld [vmem:[#allocation3 + $0x8] sm:$0xff]   ;;  %s406_s28 = sand.u32 1, %s1455_s10  }
  0x70   : > { %s410_s23 = scalar_select %p409_p8, %s1463_s12, 1  ;;  %1119 = vmatprep.subr.bf16.mxu1 %v1478_v0  ;;  %1135 = vmatprep.mubr.msk.bf16.mxu1 %vm1479_vm0, %v1478_v0  ;;  %v454_v3 = vsel %vm452_vm1, %v1269_v1, 0  ;;  %v1273_v6 = vld [vmem:[#allocation3 + $0x10] sm:$0xff]   ;;  %v1274_v7 = vld [vmem:[#allocation3 + $0x18] sm:$0xff]   ;;  %v1275_v8 = vld [vmem:[#allocation3 + $0x20] sm:$0xff]  }
  0x71   : > { %1114 = vmatpush3.bf16.msra.mxu0 %v454_v3  ;;  %1120 = vmatpush3.bf16.msra.mxu1 %v1271_v4  ;;  %v1276_v9 = vld [vmem:[#allocation3 + $0x28] sm:$0xff]   ;;  %v1277_v10 = vld [vmem:[#allocation3 + $0x30] sm:$0xff]   ;;  %v1278_v11 = vld [vmem:[#allocation3 + $0x38] sm:$0xff]   ;;  %s1076_s5 = sshll.u32 %s1463_s12, 4  ;;  %s407_s30 = scalar_lea.vmem [#allocation9], %s406_s28 }
  0x72   : > { %s1079_s27 = sshll.u32 %s410_s23, 3  ;;  %1139 = vmatprep.subr.bf16.mxu0 %v1478_v0  ;;  %1121 = vmatprep.subr.bf16.mxu1 %v1478_v0  ;;  %v1081_v12 = vld [vmem:[%s1791_s1] sm:$0xff]   ;;  %v1279_v22 = vld [vmem:[#allocation6] sm:$0xff]   ;;  %v1280_v23 = vld [vmem:[#allocation6 + $0x8] sm:$0xff]   ;;  %s918_s23 = sshll.u32 %s407_s30, 4  ;;  %s1745_s23 = int_to_ptr.vmem [resolvable:$true] %s918_s23 }
  0x73   : > { %s416_s17 = scalar_lea.vmem %s1790_s0, %s1079_s27  ;;  %v1082_v13 = vunpack.c.l.bf16 %v1081_v12  ;;  %v1083_v14 = vunpack.c.h.bf16 %v1081_v12  ;;  %v1281_v24 = vld [vmem:[#allocation6 + $0x10] sm:$0xff]   ;;  %v1282_v25 = vld [vmem:[#allocation6 + $0x18] sm:$0xff]   ;;  %v1283_v26 = vld [vmem:[#allocation6 + $0x20] sm:$0xff]   ;;  %s1743_s24 = scalar_lea.hbm %s1799_s9, %s1076_s5 }
  0x74   : > { %v1270_v2 = vld [vmem:[%s416_s17] sm:$0xff]   ;;  %v1284_v27 = vld [vmem:[#allocation6 + $0x28] sm:$0xff]   ;;  %v1286_v29 = vld [vmem:[#allocation6 + $0x38] sm:$0xff]   ;;  %s906_s17 = scalar_lea.sflag [#allocation5], %s406_s28  ;;  %s1385_s12 = scalar_lea.vmem %s1745_s23, 16 }
  0x75   : > { %1116 = vmatmul.mubr.msk.bf16.vlgmr.msra.gmra.mrb[0].mxu0 %vm448_vm2, %v1270_v2  ;;  %1122 = vmatpush3.bf16.msra.mxu1 %v1272_v5  ;;  %v1285_v28 = vld [vmem:[#allocation6 + $0x30] sm:$0xff]   ;;  %v1287_v56 = vld [vmem:[#allocation8] sm:$0xff]   ;;  %v1288_v57 = vld [vmem:[#allocation8 + $0x8] sm:$0xff]   ;;  %p1386_p13 = scmp.ne.s32.totalorder %s1745_s23, %s1385_s12  ;;  %p1825_p10 = scmp.ne.s32.totalorder %s1814_s19, 0 }
  0x76   : > { %1155 = vmatprep.mubr.msk.bf16.mxu0 %vm1479_vm0, %v1478_v0  ;;  %1123 = vmatprep.subr.bf16.mxu1 %v1478_v0  ;;  %v1050_v30 = vld [vmem:[%s1794_s4] ss:$0 sm:$0xff]  ;;  %v1290_v59 = vld [vmem:[#allocation8 + $0x18] sm:$0xff]   ;;  %v1291_v60 = vld [vmem:[#allocation8 + $0x20] sm:$0xff]   ;;  %s1480_s16 = smov [#allocation9]  }
  0x77   : > { %1140 = vmatpush3.bf16.msra.mxu0 %v1279_v22  ;;  %v1289_v58 = vld [vmem:[#allocation8 + $0x10] sm:$0xff]   ;;  %v1292_v61 = vld [vmem:[#allocation8 + $0x28] sm:$0xff]   ;;  %v1294_v63 = vld [vmem:[#allocation8 + $0x38] sm:$0xff]   ;;  %p1387_p11 = pnand %p1386_p13, %p1825_p10  ;;  %s1389_s11 = sshll.u32 %s1480_s16, 4  ;;  %s1390_s11 = int_to_ptr.vmem [resolvable:$false] %s1389_s11 }
  0x78   : > { %1141 = vmatprep.subr.bf16.mxu0 %v1478_v0  ;;  %v1293_v62 = vld [vmem:[#allocation8 + $0x30] sm:$0xff]   ;;  %s1391_s21 = scalar_lea.vmem %s1390_s11, 32  ;;  %p1392_p2 = scmp.lt.s32.totalorder %s1745_s23, %s1390_s11 }
  0x79   : > { %1124 = vmatpush3.bf16.msra.mxu1 %v1273_v6  ;;  %v1059_v1 = vld [vmem:[%s1796_s6] ss:$0 sm:$0xff]  ;;  %p1388_p0 = pneg %p1387_p11  ;;  %p1393_p3 = scmp.lt.s32.totalorder %s1391_s21, %s1385_s12 }
  0x7a   : > { %1125 = vmatprep.subr.bf16.mxu1 %v1478_v0 }
  0x7b   : > { %1142 = vmatpush3.bf16.msra.mxu0 %v1280_v23  ;;  %p1394_p5 = por %p1393_p3, %p1392_p2 }
  0x7c   : > { %1143 = vmatprep.subr.bf16.mxu0 %v1478_v0 }
  0x7d   : > { %1126 = vmatpush3.bf16.msra.mxu1 %v1274_v7  ;;  %p1395_p6 = pnand %p1394_p5, %p1388_p0 }
  0x7e   : > { %1127 = vmatprep.subr.bf16.mxu1 %v1478_v0 }
  0x7f   : > { %1144 = vmatpush3.bf16.msra.mxu0 %v1281_v24 }
  0x80   : > { %1145 = vmatprep.subr.bf16.mxu0 %v1478_v0 }
  0x81   : > { %1128 = vmatpush3.bf16.msra.mxu1 %v1275_v8 }
  0x82   : > { %1129 = vmatprep.subr.bf16.mxu1 %v1478_v0 }
  0x83   : > { %1146 = vmatpush3.bf16.msra.mxu0 %v1282_v25  ;;  %v815_v25 = vld [vmem:[%s1798_s8] sm:$0x1] }
  0x84   : > { %1147 = vmatprep.subr.bf16.mxu0 %v1478_v0 }
  0x85   : > { %1130 = vmatpush3.bf16.msra.mxu1 %v1276_v9 }
  0x86   : > { %1131 = vmatprep.subr.bf16.mxu1 %v1478_v0 }
  0x87   : > { %1148 = vmatpush3.bf16.msra.mxu0 %v1283_v26 }
  0x88   : > { %1149 = vmatprep.subr.bf16.mxu0 %v1478_v0 }
  0x89   : > { %1132 = vmatpush3.bf16.msra.mxu1 %v1277_v10 }
  0x8a   : > { %1133 = vmatprep.subr.bf16.mxu1 %v1478_v0 }
  0x8b   : > { %1150 = vmatpush3.bf16.msra.mxu0 %v1284_v27 }
  0x8c   : > { %1151 = vmatprep.subr.bf16.mxu0 %v1478_v0 }
  0x8d   : > { %1134 = vmatpush3.bf16.msra.mxu1 %v1278_v11 }
  0x8e   : > { %1159 = vmatprep.subr.bf16.mxu1 %v1478_v0 }
  0x8f   : > { %1152 = vmatpush3.bf16.msra.mxu0 %v1285_v28 }
  0x90   : > { %1153 = vmatprep.subr.bf16.mxu0 %v1478_v0 }
  0x93   : > { %1154 = vmatpush3.bf16.msra.mxu0 %v1286_v29 }
 0x148   : > { %v490_v15 = vpop.f32.mrb[0].mxu0 }
 0x149   : > { %v1117_v16 = vpop.f32.mrb[1].mxu0  ;;  %v1709_v18 = vadd.f32 %v1082_v13, %v490_v15 }
 0x14a   : > { %v493_v17 = vpop.f32.mrb[2].mxu0 }
 0x14b   : > { %v494_v19 = vadd.f32 %v1083_v14, %v493_v17  ;;  %v1118_v20 = vpop.f32.mrb[3].mxu0 }
 0x14d   : > { %v497_v21 = vpack.c.bf16 %v494_v19, %v1709_v18 }
 0x14f   : > { %1136 = vmatmul.mubr.bf16.vlgmr.msra.gmra.mrb[0].mxu1 %v497_v21 }
 0x150   : > { %1175 = vmatprep.mubr.msk.bf16.mxu1 %vm1479_vm0, %v1478_v0  ;;  %1160 = vmatpush3.bf16.msra.mxu1 %v1287_v56 }
 0x151   : > { %1161 = vmatprep.subr.bf16.mxu1 %v1478_v0 }
 0x154   : > { %1162 = vmatpush3.bf16.msra.mxu1 %v1288_v57 }
 0x155   : > { %1163 = vmatprep.subr.bf16.mxu1 %v1478_v0 }
 0x158   : > { %1164 = vmatpush3.bf16.msra.mxu1 %v1289_v58 }
 0x159   : > { %1165 = vmatprep.subr.bf16.mxu1 %v1478_v0 }
 0x15c   : > { %1166 = vmatpush3.bf16.msra.mxu1 %v1290_v59 }
 0x15d   : > { %1167 = vmatprep.subr.bf16.mxu1 %v1478_v0 }
 0x160   : > { %1168 = vmatpush3.bf16.msra.mxu1 %v1291_v60 }
 0x161   : > { %1169 = vmatprep.subr.bf16.mxu1 %v1478_v0 }
 0x164   : > { %1170 = vmatpush3.bf16.msra.mxu1 %v1292_v61 }
 0x165   : > { %1171 = vmatprep.subr.bf16.mxu1 %v1478_v0 }
 0x168   : > { %1172 = vmatpush3.bf16.msra.mxu1 %v1293_v62 }
 0x169   : > { %1173 = vmatprep.subr.bf16.mxu1 %v1478_v0 }
 0x16c   : > { %1174 = vmatpush3.bf16.msra.mxu1 %v1294_v63 }
 0x222   : > { %v603_v31 = vpop.f32.mrb[0].mxu1 }
 0x223   : > { %v604_v32 = vadd.f32 %v1050_v30, %v603_v31  ;;  %v1137_v33 = vpop.f32.mrb[1].mxu1 }
 0x224   : > { %v606_v34 = vpop.f32.mrb[2].mxu1 }
 0x225   : > { %v610_v35 = vmul.f32 %v604_v32, %v604_v32  ;;  %v607_v36 = vadd.f32 %v1050_v30, %v606_v34  ;;  %v1138_v37 = vpop.f32.mrb[3].mxu1 }
 0x227   : > { %v612_v38 = vmul.f32 %v610_v35, %v604_v32  ;;  %v611_v39 = vmul.f32 %v607_v36, %v607_v36 }
 0x229   : > { %v614_v40 = vmul.f32 0.044715, %v612_v38  ;;  %v613_v41 = vmul.f32 %v611_v39, %v607_v36 }
 0x22b   : > { %v616_v42 = vadd.f32 %v614_v40, %v604_v32  ;;  %v615_v43 = vmul.f32 0.044715, %v613_v41 }
 0x22d   : > { %v618_v44 = vmul.f32 0.7978846, %v616_v42  ;;  %v617_v45 = vadd.f32 %v615_v43, %v607_v36 }
 0x22f   : > { %1295 = vtanh.f32 %v618_v44  ;;  %v619_v46 = vmul.f32 0.7978846, %v617_v45 }
 0x231   : > { %1297 = vtanh.f32 %v619_v46 }
 0x239   : > { %v1296_v47 = vpop.eup %1295 }
 0x23a   : > { %v622_v48 = vadd.f32 1.0, %v1296_v47 }
 0x23b   : > { %v1298_v49 = vpop.eup %1297 }
 0x23c   : > { %v624_v50 = vmul.f32 0.5, %v622_v48  ;;  %v623_v51 = vadd.f32 1.0, %v1298_v49 }
 0x23e   : > { %v625_v52 = vmul.f32 0.5, %v623_v51  ;;  %v626_v53 = vmul.f32 %v624_v50, %v604_v32 }
 0x240   : > { %v627_v54 = vmul.f32 %v625_v52, %v607_v36 }
 0x242   : > { %v628_v55 = vpack.c.bf16 %v627_v54, %v626_v53 }
 0x244   : > { %1156 = vmatmul.mubr.bf16.vlgmr.msra.gmra.mrb[4].mxu0 %v628_v55 }
 0x317   : > { %v734_v2 = vpop.f32.mrb[4].mxu0 }
 0x318   : > { %v735_v3 = vadd.f32 %v1059_v1, %v734_v2  ;;  %v1157_v4 = vpop.f32.mrb[5].mxu0 }
 0x319   : > { %v737_v5 = vpop.f32.mrb[6].mxu0 }
 0x31a   : > { %v741_v6 = vmul.f32 %v735_v3, %v735_v3  ;;  %v1158_v7 = vpop.f32.mrb[7].mxu0 }
 0x31c   : > { %v743_v8 = vmul.f32 %v741_v6, %v735_v3 }
 0x31e   : > { %v745_v9 = vmul.f32 0.044715, %v743_v8 }
 0x320   : > { %v747_v10 = vadd.f32 %v745_v9, %v735_v3 }
 0x322   : > { %v749_v11 = vmul.f32 0.7978846, %v747_v10 }
 0x324   : > { %1299 = vtanh.f32 %v749_v11 }
 0x32e   : > { %v1300_v12 = vpop.eup %1299 }
 0x32f   : > { %v753_v0 = vadd.f32 1.0, %v1300_v12 }
 0x331   : > { %v755_v13 = vmul.f32 0.5, %v753_v0 }
 0x333   : > { %v757_v14 = vmul.f32 %v755_v13, %v735_v3 }
 0x335   : > { %v759_v15 = vadd.f32 %v757_v14, %v1709_v18 }
 0x337   : > { %v791_v16 = vrot.slane %v759_v15, 4 }
 0x339   : > { %v792_v17 = vadd.f32 %v791_v16, %v759_v15 }
 0x33b   : > { %v793_v19 = vrot.slane %v792_v17, 2 }
 0x33d   : > { %v794_v20 = vadd.f32 %v793_v19, %v792_v17 }
 0x33f   : > { %v795_v21 = vrot.slane %v794_v20, 1 }
 0x341   : > { %v796_v22 = vadd.f32 %v795_v21, %v794_v20 }
 0x343   : > { %v797_v23 = vmul.f32 0.125, %v796_v22 }
 0x345   : > { %v798_v24 = vpack.c.bf16 %v797_v23, %v797_v23 }
 0x347   : > { %1176 = vmatmul.mubr.bf16.vlgmr.msra.gmra.mrb[4].mxu1 %v798_v24 }
 0x41a   : > { %v898_v26 = vpop.f32.mrb[4].mxu1 }
 0x41b   : > { %v899_v18 = vadd.f32 %v898_v26, %v815_v25  ;;  %v1177_v27 = vpop.f32.mrb[5].mxu1 }
 0x41c   : > { %v901_v28 = vpop.f32.mrb[6].mxu1 }
 0x41d   : > { %904 = vst [vmem:[%s407_s30] sm:$0x1] %v899_v18  ;;  %v1178_v29 = vpop.f32.mrb[7].mxu1 }
 0x41e   : > { %1398 = shalt.err (!%p1395_p6)
}
 0x41f   : > { %s1399_s26 = scalar_lea.hbm %s1743_s24, 16  ;;  %s1403_s15 = scalar_lea.hbm %s1799_s9, 32 }
 0x420   : > { %p1400_p7 = scmp.ne.s32.totalorder %s1743_s24, %s1399_s26  ;;  %p1404_p4 = scmp.lt.u32.totalorder %s1743_s24, %s1799_s9 }
 0x421   : > { %p1405_p1 = scmp.lt.u32.totalorder %s1403_s15, %s1399_s26  ;;  %p1407_p13 = scmp.lt.u32.totalorder %s1399_s26, %s1743_s24 }
 0x422   : > { %p1401_p9 = pnand %p1400_p7, %p1825_p10 }
 0x423   : > { %p1406_p8 = por %p1405_p1, %p1404_p4 }
 0x424   : > { %p1402_p12 = pneg %p1401_p9 }
 0x425   : > { %p1408_p11 = por %p1407_p13, %p1406_p8 }
 0x427   : > { %p1409_p0 = pnand %p1408_p11, %p1402_p12 }
 0x429   : > { %1412 = shalt.err (!%p1409_p0)
}
 0x42a   : > { %1191 = dma.vmem_to_hbm [thread:$0]  (%p1825_p10), %s1745_s23, 16, %s1743_s24, %s906_s17  }
 0x42b PF: > { %s1826_s13 = sld [smem:[#allocation13_spill]]  ;;  %s1827_s29 = sld [smem:[#allocation17_spill]] }
 0x42c   : > { %p1213_p2 = scmp.ge.s32.totalorder %s1471_s14, 2 }
 0x431   : > { %s930_s5 = sand.u32 1, %s1826_s13   ;;  %p1828_p3 = scmp.ne.s32.totalorder %s1827_s29, 0 }
 0x432   : > { %s931_s30 = scalar_lea.sflag [#allocation5], %s930_s5 }
 0x433   : > { %p1204_p5 = pnand %p1213_p2, %p1828_p3 }
 0x435   : > { %1446 = dma.done.wait (!%p1204_p5), %s931_s30, 16  }
 0x436   : > { %1448 = vsyncadd (!%p1204_p5), %s931_s30, 4294967280  ;;  %s24_s14 = sadd.s32 1, %s1471_s14   ;;  %s1829_s27 = sld [smem:[#allocation14_spill]] }
 0x437   : > { %p21_p6 = scmp.ge.s32.totalorder %s24_s14, 4   ;;  %s1830_s11 = sld [smem:[#allocation18_spill]] }
 0x438   : > { %s1831_s12 = sld [smem:[#allocation15_spill]]  ;;  %s1832_s13 = sld [smem:[#allocation16_spill]] }
 0x439   : > { %s1833_s30 = smov %s1455_s10  ;;  %23 = sbr.rel (!%p21_p6) target bundleno = 8 (0x8), region = 123 }
 0x43c   : > { %s1834_s10 = smov %s1829_s27 }
 0x440   :  { %935 = vsyncpa [#allocation4], 1 }
 0x441   :  { %937 = vsyncpa [#allocation4 + $0x1], 1 }
 0x442   :  { %938 = vsyncpa [#allocation7], 1 }
 0x443   :  { %939 = vsyncpa [#allocation5], 1 }
 0x444   :  { %941 = vsyncpa [#allocation5 + $0x1], 1 }

</bundles_post_ra>
